<compile_context>
chip_gen: v7x
topology: tpu7x:2x2x1
jax: 0.10.0
libtpu: 0.0.40
codegen_flags: <defaults>
</compile_context>

<pallas_src>
import math
from functools import partial

import jax
import jax.numpy as jnp
from jax.experimental import pallas as pl
from jax.experimental.pallas import tpu as pltpu


def _round_up(n, m):
    return ((n + m - 1) // m) * m


def _tpu_vmem_capacity_bytes():
    """Physical VMEM per TensorCore (128 MiB v5e/v6e, 64 MiB v7x)."""
    try:
        return int(pltpu.get_tpu_info().vmem_capacity_bytes)
    except Exception:
        return 64 * 1024 * 1024   # conservative (v7x-sized) fallback


# ------------------------------- kernel -------------------------------------

def _fused_mlp_kernel(*refs, num_hidden, lane_dense_out):
    """refs = (x, w0, b0, ..., w_{H-1}, b_{H-1}, w_out, b_out, o)."""
    x_ref = refs[0]
    o_ref = refs[-1]
    params = refs[1:-1]

    h = x_ref[...]
    for i in range(num_hidden):
        w_ref = params[2 * i]
        b_ref = params[2 * i + 1]
        # MXU matmul in the weight dtype (bf16) with f32 accumulation.  The
        # input cast happens here in VMEM instead of a wrapper-side HBM pass.
        y = jnp.dot(h.astype(w_ref.dtype), w_ref[...],
                    preferred_element_type=jnp.float32)
        # Bias add + ReLU on the VPU in f32, then drop straight back to the
        # weight dtype (the next matmul would cast anyway) to halve the
        # intermediate VMEM / vreg / store footprint.
        h = jnp.maximum(y + b_ref[...], 0.0).astype(w_ref.dtype)

    w_out_ref = params[2 * num_hidden]
    b_out_ref = params[2 * num_hidden + 1]
    h = h.astype(w_out_ref.dtype)
    if lane_dense_out:
        # (Out, H) contracted with (tb, H) on the last dim of both -> (Out, tb):
        # batch lands on the lane axis so the HBM store is dense/unmasked even
        # for Out < 128, and we avoid an N < 128 MXU matmul.
        y = jax.lax.dot_general(w_out_ref[...], h, (((1,), (1,)), ((), ())),
                                preferred_element_type=jnp.float32)
        o_ref[...] = (y + b_out_ref[...]).astype(o_ref.dtype)
    else:
        y = jnp.dot(h, w_out_ref[...], preferred_element_type=jnp.float32)
        o_ref[...] = (y + b_out_ref[...]).astype(o_ref.dtype)


# ----------------------------- tile sizing -----------------------------------

def _choose_batch_tile(in_dim, hidden_dims, out_dim, x_itemsize, act_itemsize,
                       weight_buffer_bytes, budget_bytes):
    """Pick a batch tile (multiple of 128).  Returns (tb, per_row_bytes)."""
    per_row = 2 * in_dim * x_itemsize                 # double-buffered input tile
    # Peak activation liveness: only one matmul's input + f32 result + casted
    # output are live at a time (not the sum over all hidden widths).
    dims = [in_dim] + list(hidden_dims)
    peak_act = dims[-1] * act_itemsize + max(out_dim, 1) * 4   # head matmul
    for d_in, d_out in zip(dims[:-1], dims[1:]):
        peak_act = max(peak_act, d_in * act_itemsize + d_out * (4 + act_itemsize))
    per_row += peak_act
    per_row += 2 * max(out_dim, 1) * 4                # double-buffered output tile

    avail = budget_bytes - weight_buffer_bytes        # weights resident in VMEM
    if avail <= per_row * 128:
        # TODO(synk): stream weight slabs over a K/N reduction grid axis (f32
        # VMEM accumulator, last axis "arbitrary") when the full weight set
        # cannot stay resident (mainly a v7x 64 MiB concern).
        avail = per_row * 128
    tb = (avail // per_row) // 128 * 128
    return int(max(128, min(8192, tb))), per_row


# ------------------------------- wrapper -------------------------------------

@partial(jax.jit, static_argnames=("output_size", "single_buffer_weights"))
def mllinear_forward(x, hidden, out_w, out_b, output_size,
                     single_buffer_weights=True):
    out_dtype = x.dtype
    batch, in_dim = x.shape
    num_hidden = len(hidden)
    hidden_dims = [w.shape[1] for w, _ in hidden]
    w_dtype = hidden[0][0].dtype if num_hidden else out_w.dtype
    lane_dense_out = output_size < 128

    weight_bytes = sum(w.size * w.dtype.itemsize + b.size * b.dtype.itemsize
                       for w, b in hidden)
    weight_bytes += out_w.size * out_w.dtype.itemsize
    weight_bytes += out_b.size * out_b.dtype.itemsize
    w_buffers = 1 if single_buffer_weights else 2

    vmem_cap = _tpu_vmem_capacity_bytes()
    tb, per_row = _choose_batch_tile(
        in_dim, hidden_dims, output_size, x.dtype.itemsize,
        jnp.dtype(w_dtype).itemsize, w_buffers * weight_bytes, vmem_cap // 2)

    # Small-VMEM parts (v7x) have 2 TensorCores: keep >= 2 tiles on the
    # "parallel" batch axis so both cores get work.  Single-TC v5e/v6e (>= 96
    # MiB VMEM) skip this shrink - smaller tiles there are pure overhead.
    if vmem_cap <= 96 * 1024 * 1024 and batch >= 256:
        tb = min(tb, _round_up(pl.cdiv(batch, 2), 128))
    tb = min(tb, _round_up(batch, 128))
    num_tiles = pl.cdiv(batch, tb)   # ragged last tile: Pallas masks OOB stores

    # vmem_limit consistent with the footprint the sizer picked (+ slack),
    # clamped below physical capacity.
    vmem_limit = (w_buffers * weight_bytes + per_row * tb) * 5 // 4 + (2 << 20)
    vmem_limit = max(vmem_limit, 16 << 20)
    vmem_limit = min(vmem_limit, vmem_cap * 7 // 8)

    def resident_spec(shape):
        # Constant index_map => the block never changes across the grid;
        # Buffered(1) drops the pointless second VMEM buffer for it.
        if single_buffer_weights:
            return pl.BlockSpec(shape, lambda i: (0, 0),
                                pipeline_mode=pl.Buffered(1))
        return pl.BlockSpec(shape, lambda i: (0, 0))

    # TODO(synk): if an xprof trace on v5e shows exposed input DMA at tile
    # boundaries, bump this x spec to pipeline_mode=pl.Buffered(3).
    in_specs = [pl.BlockSpec((tb, in_dim), lambda i: (i, 0))]
    inputs = [x]
    for w, b in hidden:
        in_specs += [resident_spec(w.shape), resident_spec(b.shape)]
        inputs += [w, b]
    in_specs += [resident_spec(out_w.shape), resident_spec(out_b.shape)]
    inputs += [out_w, out_b]

    if lane_dense_out:
        out_shape = jax.ShapeDtypeStruct((output_size, batch), out_dtype)
        out_spec = pl.BlockSpec((output_size, tb), lambda i: (0, i))  # lane-dense
    else:
        out_shape = jax.ShapeDtypeStruct((batch, output_size), out_dtype)
        out_spec = pl.BlockSpec((tb, output_size), lambda i: (i, 0))

    kernel = partial(_fused_mlp_kernel, num_hidden=num_hidden,
                     lane_dense_out=lane_dense_out)

    out = pl.pallas_call(
        kernel,
        out_shape=out_shape,
        grid=(num_tiles,),
        in_specs=in_specs,
        out_specs=out_spec,
        compiler_params=pltpu.CompilerParams(
            dimension_semantics=("parallel",),       # megacore sharding on v7x
            vmem_limit_bytes=int(vmem_limit),
        ),
    )(*inputs)

    if not lane_dense_out:
        return out
    if output_size == 1:
        return out.reshape(-1)       # torch.squeeze(..., -1)
    return out.T                     # back to (batch, output_size)


# ------------------------- parameter init (matches PyTorch) ------------------

def xavier_uniform(key, out_s, in_s, dtype=jnp.float32):
    # nn.init.xavier_uniform_ for a (out_s, in_s) PyTorch weight, gain = 1.
    limit = math.sqrt(6.0 / (in_s + out_s))
    w = jax.random.uniform(key, (out_s, in_s), dtype, minval=-limit, maxval=limit)
    return w.T  # stored (in, out) so the kernel computes x @ W directly


def default_bias(key, in_s, out_s, dtype=jnp.float32):
    # PyTorch Linear default bias init: U(-1/sqrt(in), 1/sqrt(in)).
    bound = 1.0 / math.sqrt(in_s)
    return jax.random.uniform(key, (1, out_s), dtype, minval=-bound, maxval=bound)


class MLLinearPallas:
    """Pallas TPU port of AttentionXML's MLLinear."""

    def __init__(self, key, linear_size, output_size,
                 compute_dtype=jnp.bfloat16, pad_multiple=128):
        self.output_size = output_size
        self.hidden = []
        # Hidden widths zero-padded to a lane multiple (set pad_multiple=256 to
        # fill the v6e/v7x 256x256 MXU).  Padding is numerically inert.
        in_p = linear_size[0]
        for in_s, out_s in zip(linear_size[:-1], linear_size[1:]):
            key, kw, kb = jax.random.split(key, 3)
            out_p = _round_up(out_s, pad_multiple)
            w = jnp.zeros((in_p, out_p), jnp.float32)
            w = w.at[:in_s, :out_s].set(xavier_uniform(kw, out_s, in_s))
            b = jnp.zeros((1, out_p), jnp.float32)
            b = b.at[:, :out_s].set(default_bias(kb, in_s, out_s))
            self.hidden.append((w.astype(compute_dtype), b))   # bias stays f32
            in_p = out_p

        key, kw, kb = jax.random.split(key, 3)
        in_s = linear_size[-1]
        w_out = xavier_uniform(kw, output_size, in_s)      # (in_s, out)
        b_out = default_bias(kb, in_s, output_size)        # (1, out)
        if output_size < 128:
            # Lane-dense head: stored (Out, in) so the kernel emits an
            # (Out, batch_tile) result with batch on the lane axis.
            w = jnp.zeros((output_size, in_p), jnp.float32)
            w = w.at[:, :in_s].set(w_out.T)
            self.out_w = w.astype(compute_dtype)
            self.out_b = b_out.reshape(output_size, 1)      # broadcast over lanes
        else:
            w = jnp.zeros((in_p, output_size), jnp.float32)
            w = w.at[:in_s, :].set(w_out)
            self.out_w = w.astype(compute_dtype)
            self.out_b = b_out

    def __call__(self, x):
        try:
            return mllinear_forward(x, self.hidden, self.out_w, self.out_b,
                                    self.output_size, single_buffer_weights=True)
        except Exception:
            # Fallback for jax versions that reject pl.Buffered(1): identical
            # kernel, default double-buffered resident weights (VMEM-only cost).
            return mllinear_forward(x, self.hidden, self.out_w, self.out_b,
                                    self.output_size, single_buffer_weights=False)


def reference_forward(x, hidden, out_w, out_b, output_size):
    """Plain-JAX f32 reference using the same (padded, possibly bf16) params."""
    h = x.astype(jnp.float32)
    for w, b in hidden:
        h = jnp.maximum(h @ w.astype(jnp.float32) + b.astype(jnp.float32), 0.0)
    w32 = out_w.astype(jnp.float32)
    if output_size < 128:            # lane-dense storage: (out, in)
        y = h @ w32.T + out_b.astype(jnp.float32).reshape(1, -1)
    else:
        y = h @ w32 + out_b.astype(jnp.float32)
    return y.reshape(-1) if output_size == 1 else y


if __name__ == "__main__":
    key = jax.random.PRNGKey(0)
    key, kx, kp32, kpbf, kpm = jax.random.split(key, 5)

    batch = 8
    linear_size = [32, 64, 16]   # hidden chain: 32->64 (relu), 64->16 (relu)
    output_size = 1              # output Linear: 16->1, then squeeze(-1)

    x = jax.random.normal(kx, (batch, linear_size[0]), jnp.float32)

    # f32 model: tight functional check.
    model_f32 = MLLinearPallas(kp32, linear_size, output_size,
                               compute_dtype=jnp.float32)
    out_f32 = model_f32(x)
    jax.block_until_ready(out_f32)
    assert out_f32.shape == (batch,), out_f32.shape
    ref_f32 = reference_forward(x, model_f32.hidden, model_f32.out_w,
                                model_f32.out_b, output_size)
    assert jnp.allclose(out_f32, ref_f32, atol=1e-4, rtol=1e-4), \
        float(jnp.max(jnp.abs(out_f32 - ref_f32)))

    # bf16 model (default, MXU-friendly path): looser tolerance vs f32 ref.
    model_bf16 = MLLinearPallas(kpbf, linear_size, output_size,
                                compute_dtype=jnp.bfloat16)
    out_bf16 = model_bf16(x)
    jax.block_until_ready(out_bf16)
    assert out_bf16.shape == (batch,), out_bf16.shape
    ref_bf16 = reference_forward(x, model_bf16.hidden, model_bf16.out_w,
                                 model_bf16.out_b, output_size)
    assert jnp.allclose(out_bf16, ref_bf16, atol=7.5e-2, rtol=7.5e-2), \
        float(jnp.max(jnp.abs(out_bf16 - ref_bf16)))

    # Multi-output head (1 < Out < 128): exercises the lane-dense (Out, tb)
    # store + wrapper transpose; torch.squeeze(-1) is a no-op in this case.
    model_m = MLLinearPallas(kpm, linear_size, 3, compute_dtype=jnp.float32)
    out_m = model_m(x)
    jax.block_until_ready(out_m)
    assert out_m.shape == (batch, 3), out_m.shape
    ref_m = reference_forward(x, model_m.hidden, model_m.out_w, model_m.out_b, 3)
    assert jnp.allclose(out_m, ref_m, atol=1e-4, rtol=1e-4), \
        float(jnp.max(jnp.abs(out_m - ref_m)))

    print("KERNEL_OK")
</pallas_src>

<mosaic_0001>
module attributes {stable_mosaic.version = 11 : i64} {
  func.func @_fused_mlp_kernel(%arg0: i32, %arg1: memref<128x32xf32, #tpu.memory_space<vmem>>, %arg2: memref<32x128xf32, #tpu.memory_space<vmem>>, %arg3: memref<1x128xf32, #tpu.memory_space<vmem>>, %arg4: memref<128x128xf32, #tpu.memory_space<vmem>>, %arg5: memref<1x128xf32, #tpu.memory_space<vmem>>, %arg6: memref<1x128xf32, #tpu.memory_space<vmem>>, %arg7: memref<1x1xf32, #tpu.memory_space<vmem>>, %arg8: memref<1x128xf32, #tpu.memory_space<vmem>>) attributes {dimension_semantics = [#tpu.dimension_semantics<parallel>], iteration_bounds = array<i64: 1>, scalar_prefetch = 0 : i64, scratch_operands = 0 : i64, tpu.core_type = #tpu.core_type<tc>, window_params = [{transform_indices = @transform_0, window_bounds = array<i64: 128, 32>}, {pipeline_mode = #tpu.pipeline_mode<synchronous>, transform_indices = @transform_1, window_bounds = array<i64: 32, 128>}, {pipeline_mode = #tpu.pipeline_mode<synchronous>, transform_indices = @transform_2, window_bounds = array<i64: 1, 128>}, {pipeline_mode = #tpu.pipeline_mode<synchronous>, transform_indices = @transform_3, window_bounds = array<i64: 128, 128>}, {pipeline_mode = #tpu.pipeline_mode<synchronous>, transform_indices = @transform_4, window_bounds = array<i64: 1, 128>}, {pipeline_mode = #tpu.pipeline_mode<synchronous>, transform_indices = @transform_5, window_bounds = array<i64: 1, 128>}, {pipeline_mode = #tpu.pipeline_mode<synchronous>, transform_indices = @transform_6, window_bounds = array<i64: 1, 1>}, {transform_indices = @transform_7, window_bounds = array<i64: 1, 128>}]} {
    %c0 = arith.constant 0 : index
    %c0_0 = arith.constant 0 : index
    %0 = vector.load %arg1[%c0, %c0_0] : memref<128x32xf32, #tpu.memory_space<vmem>>, vector<128x32xf32>
    %c0_1 = arith.constant 0 : index
    %c0_2 = arith.constant 0 : index
    %1 = vector.load %arg2[%c0_1, %c0_2] : memref<32x128xf32, #tpu.memory_space<vmem>>, vector<32x128xf32>
    %cst = arith.constant dense<0.000000e+00> : vector<128x128xf32>
    %2 = tpu.matmul %0, %1, %cst {dimension_numbers = #tpu.dot_dimension_numbers<[1], [0], [0], [1], [0, 0, 1, 1], [], []>} : vector<128x32xf32>, vector<32x128xf32>, vector<128x128xf32> -> vector<128x128xf32>
    %c0_3 = arith.constant 0 : index
    %c0_4 = arith.constant 0 : index
    %3 = vector.load %arg3[%c0_3, %c0_4] : memref<1x128xf32, #tpu.memory_space<vmem>>, vector<1x128xf32>
    %4 = vector.broadcast %3 : vector<1x128xf32> to vector<128x128xf32>
    %5 = arith.addf %2, %4 : vector<128x128xf32>
    %cst_5 = arith.constant 0.000000e+00 : f32
    %6 = vector.broadcast %cst_5 : f32 to vector<128x128xf32>
    %7 = arith.maximumf %5, %6 : vector<128x128xf32>
    %c0_6 = arith.constant 0 : index
    %c0_7 = arith.constant 0 : index
    %8 = vector.load %arg4[%c0_6, %c0_7] : memref<128x128xf32, #tpu.memory_space<vmem>>, vector<128x128xf32>
    %cst_8 = arith.constant dense<0.000000e+00> : vector<128x128xf32>
    %9 = tpu.matmul %7, %8, %cst_8 {dimension_numbers = #tpu.dot_dimension_numbers<[1], [0], [0], [1], [0, 0, 1, 1], [], []>} : vector<128x128xf32>, vector<128x128xf32>, vector<128x128xf32> -> vector<128x128xf32>
    %c0_9 = arith.constant 0 : index
    %c0_10 = arith.constant 0 : index
    %10 = vector.load %arg5[%c0_9, %c0_10] : memref<1x128xf32, #tpu.memory_space<vmem>>, vector<1x128xf32>
    %11 = vector.broadcast %10 : vector<1x128xf32> to vector<128x128xf32>
    %12 = arith.addf %9, %11 : vector<128x128xf32>
    %cst_11 = arith.constant 0.000000e+00 : f32
    %13 = vector.broadcast %cst_11 : f32 to vector<128x128xf32>
    %14 = arith.maximumf %12, %13 : vector<128x128xf32>
    %c0_12 = arith.constant 0 : index
    %c0_13 = arith.constant 0 : index
    %15 = vector.load %arg6[%c0_12, %c0_13] : memref<1x128xf32, #tpu.memory_space<vmem>>, vector<1x128xf32>
    %cst_14 = arith.constant dense<0.000000e+00> : vector<1x128xf32>
    %16 = tpu.matmul %15, %14, %cst_14 {dimension_numbers = #tpu.dot_dimension_numbers<[1], [1], [0], [0], [0, 0, 1, 0], [], []>} : vector<1x128xf32>, vector<128x128xf32>, vector<1x128xf32> -> vector<1x128xf32>
    %c0_15 = arith.constant 0 : index
    %c0_16 = arith.constant 0 : index
    %17 = vector.load %arg7[%c0_15, %c0_16] : memref<1x1xf32, #tpu.memory_space<vmem>>, vector<1x1xf32>
    %18 = vector.broadcast %17 : vector<1x1xf32> to vector<1x128xf32>
    %19 = arith.addf %16, %18 : vector<1x128xf32>
    %c0_17 = arith.constant 0 : index
    %c0_18 = arith.constant 0 : index
    %20 = vector.load %arg8[%c0_17, %c0_18] : memref<1x128xf32, #tpu.memory_space<vmem>>, vector<1x128xf32>
    tpu.vector_store %arg8[%c0_17, %c0_18], %19 {strides = array<i32>} : memref<1x128xf32, #tpu.memory_space<vmem>>, vector<1x128xf32>,
    return
  }
  func.func @transform_0(%arg0: i32) -> (i32, i32) {
    %c0_i32 = arith.constant 0 : i32
    %c0_i32_0 = arith.constant 0 : i32
    return %arg0, %c0_i32 : i32, i32
  }
  func.func @transform_1(%arg0: i32) -> (i32, i32) {
    %c0_i32 = arith.constant 0 : i32
    %c0_i32_0 = arith.constant 0 : i32
    %c0_i32_1 = arith.constant 0 : i32
    return %c0_i32, %c0_i32_0 : i32, i32
  }
  func.func @transform_2(%arg0: i32) -> (i32, i32) {
    %c0_i32 = arith.constant 0 : i32
    %c0_i32_0 = arith.constant 0 : i32
    %c0_i32_1 = arith.constant 0 : i32
    return %c0_i32, %c0_i32_0 : i32, i32
  }
  func.func @transform_3(%arg0: i32) -> (i32, i32) {
    %c0_i32 = arith.constant 0 : i32
    %c0_i32_0 = arith.constant 0 : i32
    %c0_i32_1 = arith.constant 0 : i32
    return %c0_i32, %c0_i32_0 : i32, i32
  }
  func.func @transform_4(%arg0: i32) -> (i32, i32) {
    %c0_i32 = arith.constant 0 : i32
    %c0_i32_0 = arith.constant 0 : i32
    %c0_i32_1 = arith.constant 0 : i32
    return %c0_i32, %c0_i32_0 : i32, i32
  }
  func.func @transform_5(%arg0: i32) -> (i32, i32) {
    %c0_i32 = arith.constant 0 : i32
    %c0_i32_0 = arith.constant 0 : i32
    %c0_i32_1 = arith.constant 0 : i32
    return %c0_i32, %c0_i32_0 : i32, i32
  }
  func.func @transform_6(%arg0: i32) -> (i32, i32) {
    %c0_i32 = arith.constant 0 : i32
    %c0_i32_0 = arith.constant 0 : i32
    %c0_i32_1 = arith.constant 0 : i32
    return %c0_i32, %c0_i32_0 : i32, i32
  }
  func.func @transform_7(%arg0: i32) -> (i32, i32) {
    %c0_i32 = arith.constant 0 : i32
    %c0_i32_0 = arith.constant 0 : i32
    return %c0_i32, %arg0 : i32, i32
  }
}

module attributes {stable_mosaic.version = 11 : i64} {
  func.func @_fused_mlp_kernel(%arg0: i32, %arg1: memref<128x32xf32, #tpu.memory_space<vmem>>, %arg2: memref<32x128xf32, #tpu.memory_space<vmem>>, %arg3: memref<1x128xf32, #tpu.memory_space<vmem>>, %arg4: memref<128x128xf32, #tpu.memory_space<vmem>>, %arg5: memref<1x128xf32, #tpu.memory_space<vmem>>, %arg6: memref<1x128xf32, #tpu.memory_space<vmem>>, %arg7: memref<1x1xf32, #tpu.memory_space<vmem>>, %arg8: memref<1x128xf32, #tpu.memory_space<vmem>>) attributes {dimension_semantics = [#tpu.dimension_semantics<parallel>], iteration_bounds = array<i64: 1>, scalar_prefetch = 0 : i64, scratch_operands = 0 : i64, tpu.core_type = #tpu.core_type<tc>, window_params = [{transform_indices = @transform_0, window_bounds = array<i64: 128, 32>}, {pipeline_mode = #tpu.pipeline_mode<synchronous>, transform_indices = @transform_1, window_bounds = array<i64: 32, 128>}, {pipeline_mode = #tpu.pipeline_mode<synchronous>, transform_indices = @transform_2, window_bounds = array<i64: 1, 128>}, {pipeline_mode = #tpu.pipeline_mode<synchronous>, transform_indices = @transform_3, window_bounds = array<i64: 128, 128>}, {pipeline_mode = #tpu.pipeline_mode<synchronous>, transform_indices = @transform_4, window_bounds = array<i64: 1, 128>}, {pipeline_mode = #tpu.pipeline_mode<synchronous>, transform_indices = @transform_5, window_bounds = array<i64: 1, 128>}, {pipeline_mode = #tpu.pipeline_mode<synchronous>, transform_indices = @transform_6, window_bounds = array<i64: 1, 1>}, {transform_indices = @transform_7, window_bounds = array<i64: 1, 128>}]} {
    %c0 = arith.constant 0 : index
    %c0_0 = arith.constant 0 : index
    %0 = vector.load %arg1[%c0, %c0_0] : memref<128x32xf32, #tpu.memory_space<vmem>>, vector<128x32xf32>
    %c0_1 = arith.constant 0 : index
    %c0_2 = arith.constant 0 : index
    %1 = vector.load %arg2[%c0_1, %c0_2] : memref<32x128xf32, #tpu.memory_space<vmem>>, vector<32x128xf32>
    %cst = arith.constant dense<0.000000e+00> : vector<128x128xf32>
    %2 = tpu.matmul %0, %1, %cst {dimension_numbers = #tpu.dot_dimension_numbers<[1], [0], [0], [1], [0, 0, 1, 1], [], []>} : vector<128x32xf32>, vector<32x128xf32>, vector<128x128xf32> -> vector<128x128xf32>
    %c0_3 = arith.constant 0 : index
    %c0_4 = arith.constant 0 : index
    %3 = vector.load %arg3[%c0_3, %c0_4] : memref<1x128xf32, #tpu.memory_space<vmem>>, vector<1x128xf32>
    %4 = vector.broadcast %3 : vector<1x128xf32> to vector<128x128xf32>
    %5 = arith.addf %2, %4 : vector<128x128xf32>
    %cst_5 = arith.constant 0.000000e+00 : f32
    %6 = vector.broadcast %cst_5 : f32 to vector<128x128xf32>
    %7 = arith.maximumf %5, %6 : vector<128x128xf32>
    %c0_6 = arith.constant 0 : index
    %c0_7 = arith.constant 0 : index
    %8 = vector.load %arg4[%c0_6, %c0_7] : memref<128x128xf32, #tpu.memory_space<vmem>>, vector<128x128xf32>
    %cst_8 = arith.constant dense<0.000000e+00> : vector<128x128xf32>
    %9 = tpu.matmul %7, %8, %cst_8 {dimension_numbers = #tpu.dot_dimension_numbers<[1], [0], [0], [1], [0, 0, 1, 1], [], []>} : vector<128x128xf32>, vector<128x128xf32>, vector<128x128xf32> -> vector<128x128xf32>
    %c0_9 = arith.constant 0 : index
    %c0_10 = arith.constant 0 : index
    %10 = vector.load %arg5[%c0_9, %c0_10] : memref<1x128xf32, #tpu.memory_space<vmem>>, vector<1x128xf32>
    %11 = vector.broadcast %10 : vector<1x128xf32> to vector<128x128xf32>
    %12 = arith.addf %9, %11 : vector<128x128xf32>
    %cst_11 = arith.constant 0.000000e+00 : f32
    %13 = vector.broadcast %cst_11 : f32 to vector<128x128xf32>
    %14 = arith.maximumf %12, %13 : vector<128x128xf32>
    %c0_12 = arith.constant 0 : index
    %c0_13 = arith.constant 0 : index
    %15 = vector.load %arg6[%c0_12, %c0_13] : memref<1x128xf32, #tpu.memory_space<vmem>>, vector<1x128xf32>
    %cst_14 = arith.constant dense<0.000000e+00> : vector<1x128xf32>
    %16 = tpu.matmul %15, %14, %cst_14 {dimension_numbers = #tpu.dot_dimension_numbers<[1], [1], [0], [0], [0, 0, 1, 0], [], []>} : vector<1x128xf32>, vector<128x128xf32>, vector<1x128xf32> -> vector<1x128xf32>
    %c0_15 = arith.constant 0 : index
    %c0_16 = arith.constant 0 : index
    %17 = vector.load %arg7[%c0_15, %c0_16] : memref<1x1xf32, #tpu.memory_space<vmem>>, vector<1x1xf32>
    %18 = vector.broadcast %17 : vector<1x1xf32> to vector<1x128xf32>
    %19 = arith.addf %16, %18 : vector<1x128xf32>
    %c0_17 = arith.constant 0 : index
    %c0_18 = arith.constant 0 : index
    %20 = vector.load %arg8[%c0_17, %c0_18] : memref<1x128xf32, #tpu.memory_space<vmem>>, vector<1x128xf32>
    tpu.vector_store %arg8[%c0_17, %c0_18], %19 {strides = array<i32>} : memref<1x128xf32, #tpu.memory_space<vmem>>, vector<1x128xf32>,
    return
  }
  func.func @transform_0(%arg0: i32) -> (i32, i32) {
    %c0_i32 = arith.constant 0 : i32
    %c0_i32_0 = arith.constant 0 : i32
    return %arg0, %c0_i32 : i32, i32
  }
  func.func @transform_1(%arg0: i32) -> (i32, i32) {
    %c0_i32 = arith.constant 0 : i32
    %c0_i32_0 = arith.constant 0 : i32
    %c0_i32_1 = arith.constant 0 : i32
    return %c0_i32, %c0_i32_0 : i32, i32
  }
  func.func @transform_2(%arg0: i32) -> (i32, i32) {
    %c0_i32 = arith.constant 0 : i32
    %c0_i32_0 = arith.constant 0 : i32
    %c0_i32_1 = arith.constant 0 : i32
    return %c0_i32, %c0_i32_0 : i32, i32
  }
  func.func @transform_3(%arg0: i32) -> (i32, i32) {
    %c0_i32 = arith.constant 0 : i32
    %c0_i32_0 = arith.constant 0 : i32
    %c0_i32_1 = arith.constant 0 : i32
    return %c0_i32, %c0_i32_0 : i32, i32
  }
  func.func @transform_4(%arg0: i32) -> (i32, i32) {
    %c0_i32 = arith.constant 0 : i32
    %c0_i32_0 = arith.constant 0 : i32
    %c0_i32_1 = arith.constant 0 : i32
    return %c0_i32, %c0_i32_0 : i32, i32
  }
  func.func @transform_5(%arg0: i32) -> (i32, i32) {
    %c0_i32 = arith.constant 0 : i32
    %c0_i32_0 = arith.constant 0 : i32
    %c0_i32_1 = arith.constant 0 : i32
    return %c0_i32, %c0_i32_0 : i32, i32
  }
  func.func @transform_6(%arg0: i32) -> (i32, i32) {
    %c0_i32 = arith.constant 0 : i32
    %c0_i32_0 = arith.constant 0 : i32
    %c0_i32_1 = arith.constant 0 : i32
    return %c0_i32, %c0_i32_0 : i32, i32
  }
  func.func @transform_7(%arg0: i32) -> (i32, i32) {
    %c0_i32 = arith.constant 0 : i32
    %c0_i32_0 = arith.constant 0 : i32
    return %c0_i32, %arg0 : i32, i32
  }
}

</mosaic_0001>

<bundles_post_ra>
// kernel: mllinear_forward.1
= control target key start
LH: loop header
LB: loop body
LE: loop exit
PB: predicated region body
PF: predicated region fallthrough
CT: control target
= control target key end

     0   :  { %s1119_s0 = inlined_call_operand.hbm [shape: f32[8,32], index: 0, kind: input, shape index: {}]   ;;  %s1120_s1 = inlined_call_operand.hbm [shape: f32[32,128], index: 1, kind: input, shape index: {}]   ;;  %s1121_s2 = inlined_call_operand.vmem [shape: f32[1,128], index: 2, kind: input, shape index: {}]   ;;  %s1122_s3 = inlined_call_operand.hbm [shape: f32[128,128], index: 3, kind: input, shape index: {}]   ;;  %s1123_s4 = inlined_call_operand.vmem [shape: f32[1,128], index: 4, kind: input, shape index: {}]   ;;  %s1124_s5 = inlined_call_operand.vmem [shape: f32[1,128], index: 5, kind: input, shape index: {}]   ;;  %s1125_s6 = inlined_call_operand.<no memory space> [shape: f32[1,1], index: 6, kind: input, shape index: {}]   ;;  %s1126_s7 = inlined_call_operand.hbm [shape: f32[1,8], index: 7, kind: output, shape index: {}]  }
   0x1   :  { %v12_v0 = vstv %s1125_s6 }
   0x2   :  { %13 = vst [vmem:[#allocation2] sm:$0x1] %v12_v0 }
   0x3   :  { %14 = vsyncpa [#allocation4], 0 }
   0x4   :  { %15 = vsyncpa [#allocation7], 0 }
   0x5   :  { %16 = vsyncpa [#allocation5], 0 }
   0x6   :  { %21 = vsyncadd [#allocation4], 1920  ;;  %s968_s26 = smov [#allocation6]   ;;  %s969_s28 = smov [#allocation3]  }
   0x7   :  { %s34_s27 = sshll.u32 %s968_s26, 4  ;;  %s22_s29 = sshll.u32 %s969_s28, 4  ;;  %s35_s27 = int_to_ptr.vmem [resolvable:$true] %s34_s27  ;;  %s1021_s29 = int_to_ptr.vmem [resolvable:$true] %s22_s29 }
   0x8   :  { %s874_s9 = scalar_lea.hbm %s1120_s1, 512 }
   0x9   :  { %p875_p0 = scmp.ne.s32.totalorder %s1120_s1, %s874_s9  ;;  %p878_p1 = scmp.lt.u32.totalorder %s874_s9, %s1120_s1 }
   0xb   :  { %p880_p2 = pnand %p878_p1, %p875_p0 }
   0xd   :  { %883 = shalt.err (!%p880_p2)
}
   0xe   :  { %s884_s13 = scalar_lea.vmem %s35_s27, 512  ;;  %p889_p4 = scmp.lt.s32.totalorder %s35_s27, %s35_s27 }
   0xf   :  { %p885_p3 = scmp.ne.s32.totalorder %s35_s27, %s884_s13  ;;  %p890_p5 = scmp.lt.s32.totalorder %s884_s13, %s884_s13 }
  0x11   :  { %p891_p6 = por %p890_p5, %p889_p4 }
  0x13   :  { %p892_p7 = pnand %p891_p6, %p885_p3 }
  0x15   :  { %895 = shalt.err (!%p892_p7)
}
  0x16   :  { %s970_s14 = smov 128   ;;  %s971_s15 = smov 8  }
  0x17   :  { %40 = dma.hbm_to_vmem [thread:$0]  %s1120_s1, 512, %s35_s27, [#allocation7], %s970_s14, %s970_s14, %s971_s15  }
  0x18   :  { %s896_s20 = scalar_lea.hbm %s1119_s0, 128 }
  0x19   :  { %p897_p8 = scmp.ne.s32.totalorder %s1119_s0, %s896_s20  ;;  %p900_p9 = scmp.lt.u32.totalorder %s896_s20, %s1119_s0 }
  0x1b   :  { %p902_p10 = pnand %p900_p9, %p897_p8 }
  0x1d   :  { %905 = shalt.err (!%p902_p10)
}
  0x1e   :  { %s906_s25 = scalar_lea.vmem %s1021_s29, 128  ;;  %s910_s1 = scalar_lea.vmem %s1021_s29, 2048 }
  0x1f   :  { %p907_p11 = scmp.ne.s32.totalorder %s1021_s29, %s906_s25  ;;  %p911_p12 = scmp.lt.s32.totalorder %s1021_s29, %s1021_s29 }
  0x20   :  { %p912_p13 = scmp.lt.s32.totalorder %s910_s1, %s906_s25 }
  0x22   :  { %p913_p0 = por %p912_p13, %p911_p12 }
  0x24   :  { %p914_p1 = pnand %p913_p0, %p907_p11 }
  0x26   :  { %917 = shalt.err (!%p914_p1)
}
  0x27   :  { %28 = dma.hbm_to_vmem [thread:$0]  %s1119_s0, 128, %s1021_s29, [#allocation4], %s970_s14, %s970_s14, %s971_s15  }
  0x28   :  { %s972_s28 = smov [#allocation8]   ;;  %s918_s10 = scalar_lea.hbm %s1122_s3, 2048 }
  0x29   :  { %s48_s30 = sshll.u32 %s972_s28, 4  ;;  %p919_p2 = scmp.ne.s32.totalorder %s1122_s3, %s918_s10  ;;  %s49_s30 = int_to_ptr.vmem [resolvable:$true] %s48_s30 }
  0x2a   :  { %p922_p3 = scmp.lt.u32.totalorder %s918_s10, %s1122_s3 }
  0x2c   :  { %p924_p4 = pnand %p922_p3, %p919_p2 }
  0x2e   :  { %927 = shalt.err (!%p924_p4)
}
  0x2f   :  { %s928_s16 = scalar_lea.vmem %s49_s30, 2048  ;;  %p933_p6 = scmp.lt.s32.totalorder %s49_s30, %s49_s30 }
  0x30   :  { %p929_p5 = scmp.ne.s32.totalorder %s49_s30, %s928_s16  ;;  %p934_p7 = scmp.lt.s32.totalorder %s928_s16, %s928_s16 }
  0x32   :  { %p935_p8 = por %p934_p7, %p933_p6 }
  0x34   :  { %p936_p9 = pnand %p935_p8, %p929_p5 }
  0x36   :  { %939 = shalt.err (!%p936_p9)
}
  0x37   :  { %54 = dma.hbm_to_vmem [thread:$0]  %s1122_s3, 2048, %s49_s30, [#allocation7], %s970_s14, %s970_s14, %s971_s15  }
  0x38   :  { %962 = dma.done.wait [#allocation4], 2048  }
  0x39   :  { %963 = vsyncadd [#allocation4], 4294965248 }
  0x3a   :  { %964 = dma.done.wait [#allocation7], 2560  }
  0x3b   :  { %965 = vsyncadd [#allocation7], 4294964736  ;;  %vm97_vm0 = vcmask 261120   ;;  %v86_v1 = vld [vmem:[#allocation6] sm:$0xff]  ;;  %v87_v2 = vld [vmem:[#allocation6 + $0x8] sm:$0xff]  ;;  %vm974_vm1 = vmmov 0  }
  0x3c   :  { %v88_v3 = vld [vmem:[#allocation6 + $0x10] sm:$0xff]  ;;  %v799_v4 = vpack.c.bf16 %v87_v2, %v86_v1  ;;  %v89_v5 = vld [vmem:[#allocation6 + $0x18] sm:$0xff]  ;;  %v70_v6 = vld [vmem:[#allocation3] sm:$0xff]  ;;  %s977_s18 = smov [#allocation9]  }
  0x3d   :  { %v803_v7 = vpack.c.bf16 %v89_v5, %v88_v3  ;;  %684 = vmatprep.mubr.msk.f32.mxu1 %vm97_vm0, %v70_v6  ;;  %v307_v8 = vld [vmem:[#allocation8] sm:$0xff]  ;;  %v308_v9 = vld [vmem:[#allocation8 + $0x8] sm:$0xff]  ;;  %v309_v10 = vld [vmem:[#allocation8 + $0x10] sm:$0xff]  ;;  %s579_s19 = sshll.u32 %s977_s18, 4  ;;  %s580_s19 = int_to_ptr.vmem [resolvable:$true] %s579_s19 }
  0x3e   :  { %800 = vmatprep.subr.bf16.mxu1 %v799_v4  ;;  %v310_v11 = vld [vmem:[#allocation8 + $0x18] sm:$0xff]  ;;  %v71_v12 = vld [vmem:[#allocation3 + $0x8] sm:$0xff]  ;;  %v807_v13 = vpack.c.bf16 %v308_v9, %v307_v8  ;;  %v72_v14 = vld [vmem:[#allocation3 + $0x10] sm:$0xff]  ;;  %s940_s20 = scalar_lea.vmem %s580_s19, 16  ;;  %s944_s21 = scalar_lea.vmem %s580_s19, 32 }
  0x3f   :  { %802 = vmatpush3.bf16.msra.mxu1 %v799_v4  ;;  %v811_v15 = vpack.c.bf16 %v310_v11, %v309_v10  ;;  %v311_v16 = vld [vmem:[#allocation8 + $0x20] sm:$0xff]  ;;  %v312_v17 = vld [vmem:[#allocation8 + $0x28] sm:$0xff]  ;;  %v73_v18 = vld [vmem:[#allocation3 + $0x18] sm:$0xff]  ;;  %p941_p10 = scmp.ne.s32.totalorder %s580_s19, %s940_s20  ;;  %p945_p11 = scmp.lt.s32.totalorder %s580_s19, %s580_s19 }
  0x40   :  { %804 = vmatprep.subr.bf16.mxu1 %v803_v7  ;;  %v74_v19 = vld [vmem:[#allocation3 + $0x20] sm:$0xff]  ;;  %v815_v20 = vpack.c.bf16 %v312_v17, %v311_v16  ;;  %v313_v21 = vld [vmem:[#allocation8 + $0x30] sm:$0xff]  ;;  %v314_v22 = vld [vmem:[#allocation8 + $0x38] sm:$0xff]  ;;  %p946_p12 = scmp.lt.s32.totalorder %s944_s21, %s940_s20 }
  0x41   :  { %v75_v23 = vld [vmem:[#allocation3 + $0x28] sm:$0xff]  ;;  %v76_v24 = vld [vmem:[#allocation3 + $0x30] sm:$0xff]  ;;  %v819_v25 = vpack.c.bf16 %v314_v22, %v313_v21  ;;  %v315_v26 = vld [vmem:[#allocation8 + $0x40] sm:$0xff] }
  0x42   :  { %v316_v27 = vld [vmem:[#allocation8 + $0x48] sm:$0xff]  ;;  %v77_v28 = vld [vmem:[#allocation3 + $0x38] sm:$0xff]  ;;  %v78_v29 = vld [vmem:[#allocation3 + $0x40] sm:$0xff]  ;;  %p947_p13 = por %p946_p12, %p945_p11 }
  0x43   :  { %806 = vmatpush3.bf16.msra.mxu1 %v803_v7  ;;  %v823_v30 = vpack.c.bf16 %v316_v27, %v315_v26  ;;  %v317_v31 = vld [vmem:[#allocation8 + $0x50] sm:$0xff]  ;;  %v318_v32 = vld [vmem:[#allocation8 + $0x58] sm:$0xff]  ;;  %v79_v33 = vld [vmem:[#allocation3 + $0x48] sm:$0xff] }
  0x44   :  { %808 = vmatprep.subr.bf16.mxu1 %v807_v13  ;;  %v80_v34 = vld [vmem:[#allocation3 + $0x50] sm:$0xff]  ;;  %v827_v35 = vpack.c.bf16 %v318_v32, %v317_v31  ;;  %v319_v36 = vld [vmem:[#allocation8 + $0x60] sm:$0xff]  ;;  %v320_v37 = vld [vmem:[#allocation8 + $0x68] sm:$0xff]  ;;  %v973_v32 = vmov 0.0|0.0   ;;  %p948_p0 = pnand %p947_p13, %p941_p10 }
  0x45   :  { %v81_v38 = vld [vmem:[#allocation3 + $0x58] sm:$0xff]  ;;  %v82_v39 = vld [vmem:[#allocation3 + $0x60] sm:$0xff]  ;;  %v831_v40 = vpack.c.bf16 %v320_v37, %v319_v36  ;;  %v83_v41 = vld [vmem:[#allocation3 + $0x68] sm:$0xff]  ;;  %839 = vmatprep.subr.bf16.mxu0 %v973_v32 }
  0x46   :  { %685 = vmatmul.mubr.msk.f32.vlgmr.msra.gmra.mrb[0].mxu1 %vm97_vm0, %v71_v12  ;;  %v84_v42 = vld [vmem:[#allocation3 + $0x70] sm:$0xff]  ;;  %v85_v43 = vld [vmem:[#allocation3 + $0x78] sm:$0xff] }
  0x47   :  { %687 = vmatprep.mubr.msk.f32.mxu1 %vm97_vm0, %v72_v14  ;;  %810 = vmatpush3.bf16.msra.mxu1 %v807_v13  ;;  %v321_v44 = vld [vmem:[#allocation8 + $0x70] sm:$0xff]  ;;  %v322_v45 = vld [vmem:[#allocation8 + $0x78] sm:$0xff] }
  0x48   :  { %812 = vmatprep.subr.bf16.mxu1 %v811_v15  ;;  %v835_v46 = vpack.c.bf16 %v322_v45, %v321_v44  ;;  %v589_v47 = vld [vmem:[%s1121_s2] ss:$0 sm:$0xff] }
  0x49   :  { %v606_v36 = vld [vmem:[%s1123_s4] ss:$0 sm:$0xff] }
  0x4a   :  { %688 = vmatmul.mubr.msk.f32.gmra.mrb[2].mxu1 %vm97_vm0, %v73_v18 }
  0x4b   :  { %690 = vmatprep.mubr.msk.f32.mxu1 %vm97_vm0, %v74_v19  ;;  %814 = vmatpush3.bf16.msra.mxu1 %v811_v15 }
  0x4c   :  { %816 = vmatprep.subr.bf16.mxu1 %v815_v20 }
  0x4e   :  { %691 = vmatmul.mubr.msk.f32.gmra.mrb[4].mxu1 %vm97_vm0, %v75_v23 }
  0x4f   :  { %693 = vmatprep.mubr.msk.f32.mxu1 %vm97_vm0, %v76_v24  ;;  %818 = vmatpush3.bf16.msra.mxu1 %v815_v20 }
  0x50   :  { %820 = vmatprep.subr.bf16.mxu1 %v819_v25 }
  0x52   :  { %694 = vmatmul.mubr.msk.f32.gmra.mrb[6].mxu1 %vm97_vm0, %v77_v28 }
  0x53   :  { %696 = vmatprep.mubr.msk.f32.mxu1 %vm97_vm0, %v78_v29  ;;  %822 = vmatpush3.bf16.msra.mxu1 %v819_v25 }
  0x54   :  { %824 = vmatprep.subr.bf16.mxu1 %v823_v30 }
  0x56   :  { %697 = vmatmul.mubr.msk.f32.gmra.mrb[8].mxu1 %vm97_vm0, %v79_v33  ;;  %v975_v33 = vmov 0.0  }
  0x57   :  { %699 = vmatprep.mubr.msk.f32.mxu1 %vm97_vm0, %v80_v34  ;;  %826 = vmatpush3.bf16.msra.mxu1 %v823_v30  ;;  %v492_v34 = vld [vmem:[#allocation2] sm:$0x1] }
  0x58   :  { %828 = vmatprep.subr.bf16.mxu1 %v827_v35  ;;  %796 = vmatprep.mubr.msk.f32.mxu0 %vm974_vm1, %v975_v33 }
  0x5a   :  { %700 = vmatmul.mubr.msk.f32.gmra.mrb[10].mxu1 %vm97_vm0, %v81_v38 }
  0x5b   :  { %702 = vmatprep.mubr.msk.f32.mxu1 %vm97_vm0, %v82_v39  ;;  %830 = vmatpush3.bf16.msra.mxu1 %v827_v35  ;;  %v976_v35 = vmov 0  }
  0x5c   :  { %832 = vmatprep.subr.bf16.mxu1 %v831_v40  ;;  %873 = vset.pattern.permute.xlu0 %v976_v35 }
  0x5d   :  { %495 = vperm.xlu0 %873, %v492_v34  }
  0x5e   :  { %703 = vmatmul.mubr.msk.f32.gmra.mrb[12].mxu1 %vm97_vm0, %v83_v41 }
  0x5f   :  { %705 = vmatprep.mubr.msk.f32.mxu1 %vm97_vm0, %v84_v42  ;;  %834 = vmatpush3.bf16.msra.mxu1 %v831_v40 }
  0x60   :  { %836 = vmatprep.subr.bf16.mxu1 %v835_v46 }
  0x62   :  { %706 = vmatmul.mubr.msk.f32.gmra.mrb[14].mxu1 %vm97_vm0, %v85_v43 }
  0x63   :  { %838 = vmatpush3.bf16.msra.mxu1 %v835_v46 }
  0xdc   :  { %v496_v34 = vpop.permute.xlu0 %495 }
 0x119   :  { %v686_v48 = vpop.f32.mrb[0].mxu1 }
 0x11a   :  { %v218_v49 = vadd.f32 %v686_v48, %v589_v47  ;;  %v212_v50 = vpop.f32.mrb[1].mxu1 }
 0x11b   :  { %v213_v51 = vadd.f32 %v589_v47, %v212_v50 }
 0x11c   :  { %v292_v54 = vmax.f32 %v218_v49, 0.0 }
 0x11d   :  { %v291_v52 = vmax.f32 %v213_v51, 0.0  ;;  %v689_v53 = vpop.f32.mrb[2].mxu1 }
 0x11e   :  { %v228_v55 = vadd.f32 %v689_v53, %v589_v47  ;;  %v222_v56 = vpop.f32.mrb[3].mxu1 }
 0x11f   :  { %v223_v57 = vadd.f32 %v589_v47, %v222_v56  ;;  %740 = vmatprep.mubr.f32.mxu1 %v291_v52 }
 0x120   :  { %v294_v58 = vmax.f32 %v228_v55, 0.0  ;;  %741 = vmatmul.mubr.f32.vlgmr.msra.gmra.mrb[16].mxu1 %v292_v54 }
 0x121   :  { %v293_v59 = vmax.f32 %v223_v57, 0.0  ;;  %v692_v60 = vpop.f32.mrb[4].mxu1 }
 0x122   :  { %v238_v61 = vadd.f32 %v692_v60, %v589_v47  ;;  %v232_v62 = vpop.f32.mrb[5].mxu1 }
 0x123   :  { %743 = vmatprep.mubr.f32.mxu1 %v293_v59  ;;  %v233_v63 = vadd.f32 %v589_v47, %v232_v62 }
 0x124   :  { %744 = vmatmul.mubr.f32.gmra.mrb[18].mxu1 %v294_v58  ;;  %v296_v0 = vmax.f32 %v238_v61, 0.0 }
 0x125   :  { %v295_v1 = vmax.f32 %v233_v63, 0.0  ;;  %v695_v2 = vpop.f32.mrb[6].mxu1 }
 0x126   :  { %v248_v3 = vadd.f32 %v695_v2, %v589_v47  ;;  %v242_v4 = vpop.f32.mrb[7].mxu1 }
 0x127   :  { %746 = vmatprep.mubr.f32.mxu1 %v295_v1  ;;  %v243_v5 = vadd.f32 %v589_v47, %v242_v4 }
 0x128   :  { %747 = vmatmul.mubr.f32.gmra.mrb[20].mxu1 %v296_v0  ;;  %v298_v6 = vmax.f32 %v248_v3, 0.0 }
 0x129   :  { %v297_v7 = vmax.f32 %v243_v5, 0.0  ;;  %v698_v8 = vpop.f32.mrb[8].mxu1 }
 0x12a   :  { %v258_v9 = vadd.f32 %v698_v8, %v589_v47  ;;  %v252_v10 = vpop.f32.mrb[9].mxu1 }
 0x12b   :  { %749 = vmatprep.mubr.f32.mxu1 %v297_v7  ;;  %v253_v11 = vadd.f32 %v589_v47, %v252_v10 }
 0x12c   :  { %750 = vmatmul.mubr.f32.gmra.mrb[22].mxu1 %v298_v6  ;;  %v300_v12 = vmax.f32 %v258_v9, 0.0 }
 0x12d   :  { %v299_v13 = vmax.f32 %v253_v11, 0.0  ;;  %v701_v14 = vpop.f32.mrb[10].mxu1 }
 0x12e   :  { %v268_v15 = vadd.f32 %v701_v14, %v589_v47  ;;  %v262_v16 = vpop.f32.mrb[11].mxu1 }
 0x12f   :  { %752 = vmatprep.mubr.f32.mxu1 %v299_v13  ;;  %v263_v17 = vadd.f32 %v589_v47, %v262_v16 }
 0x130   :  { %753 = vmatmul.mubr.f32.gmra.mrb[24].mxu1 %v300_v12  ;;  %v302_v18 = vmax.f32 %v268_v15, 0.0 }
 0x131   :  { %v301_v19 = vmax.f32 %v263_v17, 0.0  ;;  %v704_v20 = vpop.f32.mrb[12].mxu1 }
 0x132   :  { %v278_v21 = vadd.f32 %v704_v20, %v589_v47  ;;  %v272_v22 = vpop.f32.mrb[13].mxu1 }
 0x133   :  { %755 = vmatprep.mubr.f32.mxu1 %v301_v19  ;;  %v273_v23 = vadd.f32 %v589_v47, %v272_v22 }
 0x134   :  { %756 = vmatmul.mubr.f32.gmra.mrb[26].mxu1 %v302_v18  ;;  %v304_v24 = vmax.f32 %v278_v21, 0.0 }
 0x135   :  { %v303_v25 = vmax.f32 %v273_v23, 0.0  ;;  %v707_v26 = vpop.f32.mrb[14].mxu1 }
 0x136   :  { %v288_v27 = vadd.f32 %v707_v26, %v589_v47  ;;  %v282_v28 = vpop.f32.mrb[15].mxu1 }
 0x137   :  { %758 = vmatprep.mubr.f32.mxu1 %v303_v25  ;;  %v283_v29 = vadd.f32 %v589_v47, %v282_v28 }
 0x138   :  { %759 = vmatmul.mubr.f32.gmra.mrb[28].mxu1 %v304_v24  ;;  %v306_v30 = vmax.f32 %v288_v27, 0.0 }
 0x139   :  { %v305_v31 = vmax.f32 %v283_v29, 0.0  ;;  %v491_v29 = vld [vmem:[%s1124_s5] sm:$0x1] }
 0x13b   :  { %761 = vmatprep.mubr.f32.mxu1 %v305_v31 }
 0x13c   :  { %762 = vmatmul.mubr.f32.gmra.mrb[30].mxu1 %v306_v30  ;;  %v498_v30 = vlaneseq }
 0x13e   :  { %v499_v31 = vshrl.u32 %v498_v30, 7 }
 0x140   :  { %v500_v33 = vsub.s32 0, %v499_v31 }
 0x142   :  { %v501_v35 = vrot.slane %v496_v34, %v500_v33 }
 0x1f3   :  { %v742_v37 = vpop.f32.mrb[16].mxu1 }
 0x1f4   :  { %v402_v38 = vadd.f32 %v742_v37, %v606_v36  ;;  %v396_v39 = vpop.f32.mrb[17].mxu1 }
 0x1f5   :  { %v397_v40 = vadd.f32 %v606_v36, %v396_v39 }
 0x1f6   :  { %v476_v41 = vmax.f32 %v402_v38, 0.0 }
 0x1f7   :  { %v475_v42 = vmax.f32 %v397_v40, 0.0  ;;  %v745_v43 = vpop.f32.mrb[18].mxu1 }
 0x1f8   :  { %v412_v44 = vadd.f32 %v745_v43, %v606_v36  ;;  %v406_v45 = vpop.f32.mrb[19].mxu1 }
 0x1f9   :  { %v407_v46 = vadd.f32 %v606_v36, %v406_v45  ;;  %v840_v47 = vpack.c.bf16 %v476_v41, %v475_v42 }
 0x1fa   :  { %v478_v48 = vmax.f32 %v412_v44, 0.0 }
 0x1fb   :  { %v477_v49 = vmax.f32 %v407_v46, 0.0  ;;  %841 = vmatpush3.bf16.xpose.msra.mxu0 %v840_v47  ;;  %v748_v50 = vpop.f32.mrb[20].mxu1 }
 0x1fc   :  { %v422_v51 = vadd.f32 %v748_v50, %v606_v36  ;;  %v416_v52 = vpop.f32.mrb[21].mxu1  ;;  %842 = vmatprep.subr.bf16.mxu0 %v973_v32 }
 0x1fd   :  { %v843_v53 = vpack.c.bf16 %v478_v48, %v477_v49  ;;  %v417_v54 = vadd.f32 %v606_v36, %v416_v52 }
 0x1fe   :  { %v480_v55 = vmax.f32 %v422_v51, 0.0 }
 0x1ff   :  { %v479_v56 = vmax.f32 %v417_v54, 0.0  ;;  %v751_v57 = vpop.f32.mrb[22].mxu1 }
 0x200   :  { %v432_v58 = vadd.f32 %v751_v57, %v606_v36  ;;  %v426_v59 = vpop.f32.mrb[23].mxu1 }
 0x201   :  { %v846_v60 = vpack.c.bf16 %v480_v55, %v479_v56  ;;  %v427_v61 = vadd.f32 %v606_v36, %v426_v59 }
 0x202   :  { %v482_v62 = vmax.f32 %v432_v58, 0.0 }
 0x203   :  { %844 = vmatpush3.bf16.xpose.msra.mxu0 %v843_v53  ;;  %v481_v63 = vmax.f32 %v427_v61, 0.0  ;;  %v754_v0 = vpop.f32.mrb[24].mxu1 }
 0x204   :  { %845 = vmatprep.subr.bf16.mxu0 %v973_v32  ;;  %v442_v1 = vadd.f32 %v754_v0, %v606_v36  ;;  %v436_v2 = vpop.f32.mrb[25].mxu1 }
 0x205   :  { %v849_v3 = vpack.c.bf16 %v482_v62, %v481_v63  ;;  %v437_v4 = vadd.f32 %v606_v36, %v436_v2 }
 0x206   :  { %v484_v5 = vmax.f32 %v442_v1, 0.0 }
 0x207   :  { %v483_v6 = vmax.f32 %v437_v4, 0.0  ;;  %v757_v7 = vpop.f32.mrb[26].mxu1 }
 0x208   :  { %v452_v8 = vadd.f32 %v757_v7, %v606_v36  ;;  %v446_v9 = vpop.f32.mrb[27].mxu1 }
 0x209   :  { %v852_v10 = vpack.c.bf16 %v484_v5, %v483_v6  ;;  %v447_v11 = vadd.f32 %v606_v36, %v446_v9 }
 0x20a   :  { %v486_v12 = vmax.f32 %v452_v8, 0.0 }
 0x20b   :  { %847 = vmatpush3.bf16.xpose.msra.mxu0 %v846_v60  ;;  %v485_v13 = vmax.f32 %v447_v11, 0.0  ;;  %v760_v14 = vpop.f32.mrb[28].mxu1 }
 0x20c   :  { %848 = vmatprep.subr.bf16.mxu0 %v973_v32  ;;  %v462_v15 = vadd.f32 %v760_v14, %v606_v36  ;;  %v456_v16 = vpop.f32.mrb[29].mxu1 }
 0x20d   :  { %v855_v17 = vpack.c.bf16 %v486_v12, %v485_v13  ;;  %v457_v18 = vadd.f32 %v606_v36, %v456_v16 }
 0x20e   :  { %v488_v19 = vmax.f32 %v462_v15, 0.0 }
 0x20f   :  { %v487_v20 = vmax.f32 %v457_v18, 0.0  ;;  %v763_v21 = vpop.f32.mrb[30].mxu1 }
 0x210   :  { %v472_v22 = vadd.f32 %v763_v21, %v606_v36  ;;  %v466_v23 = vpop.f32.mrb[31].mxu1 }
 0x211   :  { %v858_v24 = vpack.c.bf16 %v488_v19, %v487_v20  ;;  %v467_v25 = vadd.f32 %v606_v36, %v466_v23 }
 0x212   :  { %v490_v26 = vmax.f32 %v472_v22, 0.0 }
 0x213   :  { %850 = vmatpush3.bf16.xpose.msra.mxu0 %v849_v3  ;;  %v489_v27 = vmax.f32 %v467_v25, 0.0 }
 0x214   :  { %851 = vmatprep.subr.bf16.mxu0 %v973_v32 }
 0x215   :  { %v861_v28 = vpack.c.bf16 %v490_v26, %v489_v27 }
 0x21b   :  { %853 = vmatpush3.bf16.xpose.msra.mxu0 %v852_v10 }
 0x21c   :  { %854 = vmatprep.subr.bf16.mxu0 %v973_v32 }
 0x223   :  { %856 = vmatpush3.bf16.xpose.msra.mxu0 %v855_v17 }
 0x224   :  { %857 = vmatprep.subr.bf16.mxu0 %v973_v32 }
 0x22b   :  { %859 = vmatpush3.bf16.xpose.msra.mxu0 %v858_v24 }
 0x22c   :  { %860 = vmatprep.subr.bf16.mxu0 %v973_v32 }
 0x233   :  { %862 = vmatpush3.bf16.xpose.msra.mxu0 %v861_v28 }
 0x23a   :  { %797 = vmatmul.mubr.f32.vlgmr.msra.gmra.mrb[0].mxu0 %v491_v29 }
 0x30d   :  { %v568_v36 = vpop.f32.mrb[0].mxu0 }
 0x30e   :  { %v569_v37 = vadd.f32 %v568_v36, %v501_v35  ;;  %v798_v38 = vpop.f32.mrb[1].mxu0 }
 0x310   :  { %572 = vst [vmem:[#allocation9] sm:$0x1] %v569_v37 }
 0x311   :  { %951 = shalt.err (!%p948_p0)
}
 0x312   :  { %s952_s23 = scalar_lea.hbm %s1126_s7, 16 }
 0x313   :  { %p953_p1 = scmp.ne.s32.totalorder %s1126_s7, %s952_s23  ;;  %p956_p2 = scmp.lt.u32.totalorder %s952_s23, %s1126_s7 }
 0x315   :  { %p958_p3 = pnand %p956_p2, %p953_p1 }
 0x317   :  { %961 = shalt.err (!%p958_p3)
}
 0x318   :  { %582 = dma.vmem_to_hbm [thread:$0]  %s580_s19, 16, %s1126_s7, [#allocation5]  }
 0x319   :  { %966 = dma.done.wait [#allocation5], 16  }
 0x31a   :  { %967 = vsyncadd [#allocation5], 4294967280 }
 0x31b   :  { %586 = vsyncpa [#allocation4], 1 }
 0x31c   :  { %587 = vsyncpa [#allocation7], 1 }
 0x31d   :  { %588 = vsyncpa [#allocation5], 1 }

// kernel: mllinear_forward.1
= control target key start
LH: loop header
LB: loop body
LE: loop exit
PB: predicated region body
PF: predicated region fallthrough
CT: control target
= control target key end

     0   :  { %s1119_s0 = inlined_call_operand.hbm [shape: f32[8,32], index: 0, kind: input, shape index: {}]   ;;  %s1120_s1 = inlined_call_operand.hbm [shape: f32[32,128], index: 1, kind: input, shape index: {}]   ;;  %s1121_s2 = inlined_call_operand.vmem [shape: f32[1,128], index: 2, kind: input, shape index: {}]   ;;  %s1122_s3 = inlined_call_operand.hbm [shape: f32[128,128], index: 3, kind: input, shape index: {}]   ;;  %s1123_s4 = inlined_call_operand.vmem [shape: f32[1,128], index: 4, kind: input, shape index: {}]   ;;  %s1124_s5 = inlined_call_operand.vmem [shape: f32[1,128], index: 5, kind: input, shape index: {}]   ;;  %s1125_s6 = inlined_call_operand.<no memory space> [shape: f32[1,1], index: 6, kind: input, shape index: {}]   ;;  %s1126_s7 = inlined_call_operand.hbm [shape: f32[1,8], index: 7, kind: output, shape index: {}]  }
   0x1   :  { %v12_v0 = vstv %s1125_s6 }
   0x2   :  { %13 = vst [vmem:[#allocation2] sm:$0x1] %v12_v0 }
   0x3   :  { %14 = vsyncpa [#allocation4], 0 }
   0x4   :  { %15 = vsyncpa [#allocation7], 0 }
   0x5   :  { %16 = vsyncpa [#allocation5], 0 }
   0x6   :  { %21 = vsyncadd [#allocation4], 1920  ;;  %s968_s26 = smov [#allocation6]   ;;  %s969_s28 = smov [#allocation3]  }
   0x7   :  { %s34_s27 = sshll.u32 %s968_s26, 4  ;;  %s22_s29 = sshll.u32 %s969_s28, 4  ;;  %s35_s27 = int_to_ptr.vmem [resolvable:$true] %s34_s27  ;;  %s1021_s29 = int_to_ptr.vmem [resolvable:$true] %s22_s29 }
   0x8   :  { %s874_s9 = scalar_lea.hbm %s1120_s1, 512 }
   0x9   :  { %p875_p0 = scmp.ne.s32.totalorder %s1120_s1, %s874_s9  ;;  %p878_p1 = scmp.lt.u32.totalorder %s874_s9, %s1120_s1 }
   0xb   :  { %p880_p2 = pnand %p878_p1, %p875_p0 }
   0xd   :  { %883 = shalt.err (!%p880_p2)
}
   0xe   :  { %s884_s13 = scalar_lea.vmem %s35_s27, 512  ;;  %p889_p4 = scmp.lt.s32.totalorder %s35_s27, %s35_s27 }
   0xf   :  { %p885_p3 = scmp.ne.s32.totalorder %s35_s27, %s884_s13  ;;  %p890_p5 = scmp.lt.s32.totalorder %s884_s13, %s884_s13 }
  0x11   :  { %p891_p6 = por %p890_p5, %p889_p4 }
  0x13   :  { %p892_p7 = pnand %p891_p6, %p885_p3 }
  0x15   :  { %895 = shalt.err (!%p892_p7)
}
  0x16   :  { %s970_s14 = smov 128   ;;  %s971_s15 = smov 8  }
  0x17   :  { %40 = dma.hbm_to_vmem [thread:$0]  %s1120_s1, 512, %s35_s27, [#allocation7], %s970_s14, %s970_s14, %s971_s15  }
  0x18   :  { %s896_s20 = scalar_lea.hbm %s1119_s0, 128 }
  0x19   :  { %p897_p8 = scmp.ne.s32.totalorder %s1119_s0, %s896_s20  ;;  %p900_p9 = scmp.lt.u32.totalorder %s896_s20, %s1119_s0 }
  0x1b   :  { %p902_p10 = pnand %p900_p9, %p897_p8 }
  0x1d   :  { %905 = shalt.err (!%p902_p10)
}
  0x1e   :  { %s906_s25 = scalar_lea.vmem %s1021_s29, 128  ;;  %s910_s1 = scalar_lea.vmem %s1021_s29, 2048 }
  0x1f   :  { %p907_p11 = scmp.ne.s32.totalorder %s1021_s29, %s906_s25  ;;  %p911_p12 = scmp.lt.s32.totalorder %s1021_s29, %s1021_s29 }
  0x20   :  { %p912_p13 = scmp.lt.s32.totalorder %s910_s1, %s906_s25 }
  0x22   :  { %p913_p0 = por %p912_p13, %p911_p12 }
  0x24   :  { %p914_p1 = pnand %p913_p0, %p907_p11 }
  0x26   :  { %917 = shalt.err (!%p914_p1)
}
  0x27   :  { %28 = dma.hbm_to_vmem [thread:$0]  %s1119_s0, 128, %s1021_s29, [#allocation4], %s970_s14, %s970_s14, %s971_s15  }
  0x28   :  { %s972_s28 = smov [#allocation8]   ;;  %s918_s10 = scalar_lea.hbm %s1122_s3, 2048 }
  0x29   :  { %s48_s30 = sshll.u32 %s972_s28, 4  ;;  %p919_p2 = scmp.ne.s32.totalorder %s1122_s3, %s918_s10  ;;  %s49_s30 = int_to_ptr.vmem [resolvable:$true] %s48_s30 }
  0x2a   :  { %p922_p3 = scmp.lt.u32.totalorder %s918_s10, %s1122_s3 }
  0x2c   :  { %p924_p4 = pnand %p922_p3, %p919_p2 }
  0x2e   :  { %927 = shalt.err (!%p924_p4)
}
  0x2f   :  { %s928_s16 = scalar_lea.vmem %s49_s30, 2048  ;;  %p933_p6 = scmp.lt.s32.totalorder %s49_s30, %s49_s30 }
  0x30   :  { %p929_p5 = scmp.ne.s32.totalorder %s49_s30, %s928_s16  ;;  %p934_p7 = scmp.lt.s32.totalorder %s928_s16, %s928_s16 }
  0x32   :  { %p935_p8 = por %p934_p7, %p933_p6 }
  0x34   :  { %p936_p9 = pnand %p935_p8, %p929_p5 }
  0x36   :  { %939 = shalt.err (!%p936_p9)
}
  0x37   :  { %54 = dma.hbm_to_vmem [thread:$0]  %s1122_s3, 2048, %s49_s30, [#allocation7], %s970_s14, %s970_s14, %s971_s15  }
  0x38   :  { %962 = dma.done.wait [#allocation4], 2048  }
  0x39   :  { %963 = vsyncadd [#allocation4], 4294965248 }
  0x3a   :  { %964 = dma.done.wait [#allocation7], 2560  }
  0x3b   :  { %965 = vsyncadd [#allocation7], 4294964736  ;;  %vm97_vm0 = vcmask 261120   ;;  %v86_v1 = vld [vmem:[#allocation6] sm:$0xff]  ;;  %v87_v2 = vld [vmem:[#allocation6 + $0x8] sm:$0xff]  ;;  %vm974_vm1 = vmmov 0  }
  0x3c   :  { %v88_v3 = vld [vmem:[#allocation6 + $0x10] sm:$0xff]  ;;  %v799_v4 = vpack.c.bf16 %v87_v2, %v86_v1  ;;  %v89_v5 = vld [vmem:[#allocation6 + $0x18] sm:$0xff]  ;;  %v70_v6 = vld [vmem:[#allocation3] sm:$0xff]  ;;  %s977_s18 = smov [#allocation9]  }
  0x3d   :  { %v803_v7 = vpack.c.bf16 %v89_v5, %v88_v3  ;;  %684 = vmatprep.mubr.msk.f32.mxu1 %vm97_vm0, %v70_v6  ;;  %v307_v8 = vld [vmem:[#allocation8] sm:$0xff]  ;;  %v308_v9 = vld [vmem:[#allocation8 + $0x8] sm:$0xff]  ;;  %v309_v10 = vld [vmem:[#allocation8 + $0x10] sm:$0xff]  ;;  %s579_s19 = sshll.u32 %s977_s18, 4  ;;  %s580_s19 = int_to_ptr.vmem [resolvable:$true] %s579_s19 }
  0x3e   :  { %800 = vmatprep.subr.bf16.mxu1 %v799_v4  ;;  %v310_v11 = vld [vmem:[#allocation8 + $0x18] sm:$0xff]  ;;  %v71_v12 = vld [vmem:[#allocation3 + $0x8] sm:$0xff]  ;;  %v807_v13 = vpack.c.bf16 %v308_v9, %v307_v8  ;;  %v72_v14 = vld [vmem:[#allocation3 + $0x10] sm:$0xff]  ;;  %s940_s20 = scalar_lea.vmem %s580_s19, 16  ;;  %s944_s21 = scalar_lea.vmem %s580_s19, 32 }
  0x3f   :  { %802 = vmatpush3.bf16.msra.mxu1 %v799_v4  ;;  %v811_v15 = vpack.c.bf16 %v310_v11, %v309_v10  ;;  %v311_v16 = vld [vmem:[#allocation8 + $0x20] sm:$0xff]  ;;  %v312_v17 = vld [vmem:[#allocation8 + $0x28] sm:$0xff]  ;;  %v73_v18 = vld [vmem:[#allocation3 + $0x18] sm:$0xff]  ;;  %p941_p10 = scmp.ne.s32.totalorder %s580_s19, %s940_s20  ;;  %p945_p11 = scmp.lt.s32.totalorder %s580_s19, %s580_s19 }
  0x40   :  { %804 = vmatprep.subr.bf16.mxu1 %v803_v7  ;;  %v74_v19 = vld [vmem:[#allocation3 + $0x20] sm:$0xff]  ;;  %v815_v20 = vpack.c.bf16 %v312_v17, %v311_v16  ;;  %v313_v21 = vld [vmem:[#allocation8 + $0x30] sm:$0xff]  ;;  %v314_v22 = vld [vmem:[#allocation8 + $0x38] sm:$0xff]  ;;  %p946_p12 = scmp.lt.s32.totalorder %s944_s21, %s940_s20 }
  0x41   :  { %v75_v23 = vld [vmem:[#allocation3 + $0x28] sm:$0xff]  ;;  %v76_v24 = vld [vmem:[#allocation3 + $0x30] sm:$0xff]  ;;  %v819_v25 = vpack.c.bf16 %v314_v22, %v313_v21  ;;  %v315_v26 = vld [vmem:[#allocation8 + $0x40] sm:$0xff] }
  0x42   :  { %v316_v27 = vld [vmem:[#allocation8 + $0x48] sm:$0xff]  ;;  %v77_v28 = vld [vmem:[#allocation3 + $0x38] sm:$0xff]  ;;  %v78_v29 = vld [vmem:[#allocation3 + $0x40] sm:$0xff]  ;;  %p947_p13 = por %p946_p12, %p945_p11 }
  0x43   :  { %806 = vmatpush3.bf16.msra.mxu1 %v803_v7  ;;  %v823_v30 = vpack.c.bf16 %v316_v27, %v315_v26  ;;  %v317_v31 = vld [vmem:[#allocation8 + $0x50] sm:$0xff]  ;;  %v318_v32 = vld [vmem:[#allocation8 + $0x58] sm:$0xff]  ;;  %v79_v33 = vld [vmem:[#allocation3 + $0x48] sm:$0xff] }
  0x44   :  { %808 = vmatprep.subr.bf16.mxu1 %v807_v13  ;;  %v80_v34 = vld [vmem:[#allocation3 + $0x50] sm:$0xff]  ;;  %v827_v35 = vpack.c.bf16 %v318_v32, %v317_v31  ;;  %v319_v36 = vld [vmem:[#allocation8 + $0x60] sm:$0xff]  ;;  %v320_v37 = vld [vmem:[#allocation8 + $0x68] sm:$0xff]  ;;  %v973_v32 = vmov 0.0|0.0   ;;  %p948_p0 = pnand %p947_p13, %p941_p10 }
  0x45   :  { %v81_v38 = vld [vmem:[#allocation3 + $0x58] sm:$0xff]  ;;  %v82_v39 = vld [vmem:[#allocation3 + $0x60] sm:$0xff]  ;;  %v831_v40 = vpack.c.bf16 %v320_v37, %v319_v36  ;;  %v83_v41 = vld [vmem:[#allocation3 + $0x68] sm:$0xff]  ;;  %839 = vmatprep.subr.bf16.mxu0 %v973_v32 }
  0x46   :  { %685 = vmatmul.mubr.msk.f32.vlgmr.msra.gmra.mrb[0].mxu1 %vm97_vm0, %v71_v12  ;;  %v84_v42 = vld [vmem:[#allocation3 + $0x70] sm:$0xff]  ;;  %v85_v43 = vld [vmem:[#allocation3 + $0x78] sm:$0xff] }
  0x47   :  { %687 = vmatprep.mubr.msk.f32.mxu1 %vm97_vm0, %v72_v14  ;;  %810 = vmatpush3.bf16.msra.mxu1 %v807_v13  ;;  %v321_v44 = vld [vmem:[#allocation8 + $0x70] sm:$0xff]  ;;  %v322_v45 = vld [vmem:[#allocation8 + $0x78] sm:$0xff] }
  0x48   :  { %812 = vmatprep.subr.bf16.mxu1 %v811_v15  ;;  %v835_v46 = vpack.c.bf16 %v322_v45, %v321_v44  ;;  %v589_v47 = vld [vmem:[%s1121_s2] ss:$0 sm:$0xff] }
  0x49   :  { %v606_v36 = vld [vmem:[%s1123_s4] ss:$0 sm:$0xff] }
  0x4a   :  { %688 = vmatmul.mubr.msk.f32.gmra.mrb[2].mxu1 %vm97_vm0, %v73_v18 }
  0x4b   :  { %690 = vmatprep.mubr.msk.f32.mxu1 %vm97_vm0, %v74_v19  ;;  %814 = vmatpush3.bf16.msra.mxu1 %v811_v15 }
  0x4c   :  { %816 = vmatprep.subr.bf16.mxu1 %v815_v20 }
  0x4e   :  { %691 = vmatmul.mubr.msk.f32.gmra.mrb[4].mxu1 %vm97_vm0, %v75_v23 }
  0x4f   :  { %693 = vmatprep.mubr.msk.f32.mxu1 %vm97_vm0, %v76_v24  ;;  %818 = vmatpush3.bf16.msra.mxu1 %v815_v20 }
  0x50   :  { %820 = vmatprep.subr.bf16.mxu1 %v819_v25 }
  0x52   :  { %694 = vmatmul.mubr.msk.f32.gmra.mrb[6].mxu1 %vm97_vm0, %v77_v28 }
  0x53   :  { %696 = vmatprep.mubr.msk.f32.mxu1 %vm97_vm0, %v78_v29  ;;  %822 = vmatpush3.bf16.msra.mxu1 %v819_v25 }
  0x54   :  { %824 = vmatprep.subr.bf16.mxu1 %v823_v30 }
  0x56   :  { %697 = vmatmul.mubr.msk.f32.gmra.mrb[8].mxu1 %vm97_vm0, %v79_v33  ;;  %v975_v33 = vmov 0.0  }
  0x57   :  { %699 = vmatprep.mubr.msk.f32.mxu1 %vm97_vm0, %v80_v34  ;;  %826 = vmatpush3.bf16.msra.mxu1 %v823_v30  ;;  %v492_v34 = vld [vmem:[#allocation2] sm:$0x1] }
  0x58   :  { %828 = vmatprep.subr.bf16.mxu1 %v827_v35  ;;  %796 = vmatprep.mubr.msk.f32.mxu0 %vm974_vm1, %v975_v33 }
  0x5a   :  { %700 = vmatmul.mubr.msk.f32.gmra.mrb[10].mxu1 %vm97_vm0, %v81_v38 }
  0x5b   :  { %702 = vmatprep.mubr.msk.f32.mxu1 %vm97_vm0, %v82_v39  ;;  %830 = vmatpush3.bf16.msra.mxu1 %v827_v35  ;;  %v976_v35 = vmov 0  }
  0x5c   :  { %832 = vmatprep.subr.bf16.mxu1 %v831_v40  ;;  %873 = vset.pattern.permute.xlu0 %v976_v35 }
  0x5d   :  { %495 = vperm.xlu0 %873, %v492_v34  }
  0x5e   :  { %703 = vmatmul.mubr.msk.f32.gmra.mrb[12].mxu1 %vm97_vm0, %v83_v41 }
  0x5f   :  { %705 = vmatprep.mubr.msk.f32.mxu1 %vm97_vm0, %v84_v42  ;;  %834 = vmatpush3.bf16.msra.mxu1 %v831_v40 }
  0x60   :  { %836 = vmatprep.subr.bf16.mxu1 %v835_v46 }
  0x62   :  { %706 = vmatmul.mubr.msk.f32.gmra.mrb[14].mxu1 %vm97_vm0, %v85_v43 }
  0x63   :  { %838 = vmatpush3.bf16.msra.mxu1 %v835_v46 }
  0xdc   :  { %v496_v34 = vpop.permute.xlu0 %495 }
 0x119   :  { %v686_v48 = vpop.f32.mrb[0].mxu1 }
 0x11a   :  { %v218_v49 = vadd.f32 %v686_v48, %v589_v47  ;;  %v212_v50 = vpop.f32.mrb[1].mxu1 }
 0x11b   :  { %v213_v51 = vadd.f32 %v589_v47, %v212_v50 }
 0x11c   :  { %v292_v54 = vmax.f32 %v218_v49, 0.0 }
 0x11d   :  { %v291_v52 = vmax.f32 %v213_v51, 0.0  ;;  %v689_v53 = vpop.f32.mrb[2].mxu1 }
 0x11e   :  { %v228_v55 = vadd.f32 %v689_v53, %v589_v47  ;;  %v222_v56 = vpop.f32.mrb[3].mxu1 }
 0x11f   :  { %v223_v57 = vadd.f32 %v589_v47, %v222_v56  ;;  %740 = vmatprep.mubr.f32.mxu1 %v291_v52 }
 0x120   :  { %v294_v58 = vmax.f32 %v228_v55, 0.0  ;;  %741 = vmatmul.mubr.f32.vlgmr.msra.gmra.mrb[16].mxu1 %v292_v54 }
 0x121   :  { %v293_v59 = vmax.f32 %v223_v57, 0.0  ;;  %v692_v60 = vpop.f32.mrb[4].mxu1 }
 0x122   :  { %v238_v61 = vadd.f32 %v692_v60, %v589_v47  ;;  %v232_v62 = vpop.f32.mrb[5].mxu1 }
 0x123   :  { %743 = vmatprep.mubr.f32.mxu1 %v293_v59  ;;  %v233_v63 = vadd.f32 %v589_v47, %v232_v62 }
 0x124   :  { %744 = vmatmul.mubr.f32.gmra.mrb[18].mxu1 %v294_v58  ;;  %v296_v0 = vmax.f32 %v238_v61, 0.0 }
 0x125   :  { %v295_v1 = vmax.f32 %v233_v63, 0.0  ;;  %v695_v2 = vpop.f32.mrb[6].mxu1 }
 0x126   :  { %v248_v3 = vadd.f32 %v695_v2, %v589_v47  ;;  %v242_v4 = vpop.f32.mrb[7].mxu1 }
 0x127   :  { %746 = vmatprep.mubr.f32.mxu1 %v295_v1  ;;  %v243_v5 = vadd.f32 %v589_v47, %v242_v4 }
 0x128   :  { %747 = vmatmul.mubr.f32.gmra.mrb[20].mxu1 %v296_v0  ;;  %v298_v6 = vmax.f32 %v248_v3, 0.0 }
 0x129   :  { %v297_v7 = vmax.f32 %v243_v5, 0.0  ;;  %v698_v8 = vpop.f32.mrb[8].mxu1 }
 0x12a   :  { %v258_v9 = vadd.f32 %v698_v8, %v589_v47  ;;  %v252_v10 = vpop.f32.mrb[9].mxu1 }
 0x12b   :  { %749 = vmatprep.mubr.f32.mxu1 %v297_v7  ;;  %v253_v11 = vadd.f32 %v589_v47, %v252_v10 }
 0x12c   :  { %750 = vmatmul.mubr.f32.gmra.mrb[22].mxu1 %v298_v6  ;;  %v300_v12 = vmax.f32 %v258_v9, 0.0 }
 0x12d   :  { %v299_v13 = vmax.f32 %v253_v11, 0.0  ;;  %v701_v14 = vpop.f32.mrb[10].mxu1 }
 0x12e   :  { %v268_v15 = vadd.f32 %v701_v14, %v589_v47  ;;  %v262_v16 = vpop.f32.mrb[11].mxu1 }
 0x12f   :  { %752 = vmatprep.mubr.f32.mxu1 %v299_v13  ;;  %v263_v17 = vadd.f32 %v589_v47, %v262_v16 }
 0x130   :  { %753 = vmatmul.mubr.f32.gmra.mrb[24].mxu1 %v300_v12  ;;  %v302_v18 = vmax.f32 %v268_v15, 0.0 }
 0x131   :  { %v301_v19 = vmax.f32 %v263_v17, 0.0  ;;  %v704_v20 = vpop.f32.mrb[12].mxu1 }
 0x132   :  { %v278_v21 = vadd.f32 %v704_v20, %v589_v47  ;;  %v272_v22 = vpop.f32.mrb[13].mxu1 }
 0x133   :  { %755 = vmatprep.mubr.f32.mxu1 %v301_v19  ;;  %v273_v23 = vadd.f32 %v589_v47, %v272_v22 }
 0x134   :  { %756 = vmatmul.mubr.f32.gmra.mrb[26].mxu1 %v302_v18  ;;  %v304_v24 = vmax.f32 %v278_v21, 0.0 }
 0x135   :  { %v303_v25 = vmax.f32 %v273_v23, 0.0  ;;  %v707_v26 = vpop.f32.mrb[14].mxu1 }
 0x136   :  { %v288_v27 = vadd.f32 %v707_v26, %v589_v47  ;;  %v282_v28 = vpop.f32.mrb[15].mxu1 }
 0x137   :  { %758 = vmatprep.mubr.f32.mxu1 %v303_v25  ;;  %v283_v29 = vadd.f32 %v589_v47, %v282_v28 }
 0x138   :  { %759 = vmatmul.mubr.f32.gmra.mrb[28].mxu1 %v304_v24  ;;  %v306_v30 = vmax.f32 %v288_v27, 0.0 }
 0x139   :  { %v305_v31 = vmax.f32 %v283_v29, 0.0  ;;  %v491_v29 = vld [vmem:[%s1124_s5] sm:$0x1] }
 0x13b   :  { %761 = vmatprep.mubr.f32.mxu1 %v305_v31 }
 0x13c   :  { %762 = vmatmul.mubr.f32.gmra.mrb[30].mxu1 %v306_v30  ;;  %v498_v30 = vlaneseq }
 0x13e   :  { %v499_v31 = vshrl.u32 %v498_v30, 7 }
 0x140   :  { %v500_v33 = vsub.s32 0, %v499_v31 }
 0x142   :  { %v501_v35 = vrot.slane %v496_v34, %v500_v33 }
 0x1f3   :  { %v742_v37 = vpop.f32.mrb[16].mxu1 }
 0x1f4   :  { %v402_v38 = vadd.f32 %v742_v37, %v606_v36  ;;  %v396_v39 = vpop.f32.mrb[17].mxu1 }
 0x1f5   :  { %v397_v40 = vadd.f32 %v606_v36, %v396_v39 }
 0x1f6   :  { %v476_v41 = vmax.f32 %v402_v38, 0.0 }
 0x1f7   :  { %v475_v42 = vmax.f32 %v397_v40, 0.0  ;;  %v745_v43 = vpop.f32.mrb[18].mxu1 }
 0x1f8   :  { %v412_v44 = vadd.f32 %v745_v43, %v606_v36  ;;  %v406_v45 = vpop.f32.mrb[19].mxu1 }
 0x1f9   :  { %v407_v46 = vadd.f32 %v606_v36, %v406_v45  ;;  %v840_v47 = vpack.c.bf16 %v476_v41, %v475_v42 }
 0x1fa   :  { %v478_v48 = vmax.f32 %v412_v44, 0.0 }
 0x1fb   :  { %v477_v49 = vmax.f32 %v407_v46, 0.0  ;;  %841 = vmatpush3.bf16.xpose.msra.mxu0 %v840_v47  ;;  %v748_v50 = vpop.f32.mrb[20].mxu1 }
 0x1fc   :  { %v422_v51 = vadd.f32 %v748_v50, %v606_v36  ;;  %v416_v52 = vpop.f32.mrb[21].mxu1  ;;  %842 = vmatprep.subr.bf16.mxu0 %v973_v32 }
 0x1fd   :  { %v843_v53 = vpack.c.bf16 %v478_v48, %v477_v49  ;;  %v417_v54 = vadd.f32 %v606_v36, %v416_v52 }
 0x1fe   :  { %v480_v55 = vmax.f32 %v422_v51, 0.0 }
 0x1ff   :  { %v479_v56 = vmax.f32 %v417_v54, 0.0  ;;  %v751_v57 = vpop.f32.mrb[22].mxu1 }
 0x200   :  { %v432_v58 = vadd.f32 %v751_v57, %v606_v36  ;;  %v426_v59 = vpop.f32.mrb[23].mxu1 }
 0x201   :  { %v846_v60 = vpack.c.bf16 %v480_v55, %v479_v56  ;;  %v427_v61 = vadd.f32 %v606_v36, %v426_v59 }
 0x202   :  { %v482_v62 = vmax.f32 %v432_v58, 0.0 }
 0x203   :  { %844 = vmatpush3.bf16.xpose.msra.mxu0 %v843_v53  ;;  %v481_v63 = vmax.f32 %v427_v61, 0.0  ;;  %v754_v0 = vpop.f32.mrb[24].mxu1 }
 0x204   :  { %845 = vmatprep.subr.bf16.mxu0 %v973_v32  ;;  %v442_v1 = vadd.f32 %v754_v0, %v606_v36  ;;  %v436_v2 = vpop.f32.mrb[25].mxu1 }
 0x205   :  { %v849_v3 = vpack.c.bf16 %v482_v62, %v481_v63  ;;  %v437_v4 = vadd.f32 %v606_v36, %v436_v2 }
 0x206   :  { %v484_v5 = vmax.f32 %v442_v1, 0.0 }
 0x207   :  { %v483_v6 = vmax.f32 %v437_v4, 0.0  ;;  %v757_v7 = vpop.f32.mrb[26].mxu1 }
 0x208   :  { %v452_v8 = vadd.f32 %v757_v7, %v606_v36  ;;  %v446_v9 = vpop.f32.mrb[27].mxu1 }
 0x209   :  { %v852_v10 = vpack.c.bf16 %v484_v5, %v483_v6  ;;  %v447_v11 = vadd.f32 %v606_v36, %v446_v9 }
 0x20a   :  { %v486_v12 = vmax.f32 %v452_v8, 0.0 }
 0x20b   :  { %847 = vmatpush3.bf16.xpose.msra.mxu0 %v846_v60  ;;  %v485_v13 = vmax.f32 %v447_v11, 0.0  ;;  %v760_v14 = vpop.f32.mrb[28].mxu1 }
 0x20c   :  { %848 = vmatprep.subr.bf16.mxu0 %v973_v32  ;;  %v462_v15 = vadd.f32 %v760_v14, %v606_v36  ;;  %v456_v16 = vpop.f32.mrb[29].mxu1 }
 0x20d   :  { %v855_v17 = vpack.c.bf16 %v486_v12, %v485_v13  ;;  %v457_v18 = vadd.f32 %v606_v36, %v456_v16 }
 0x20e   :  { %v488_v19 = vmax.f32 %v462_v15, 0.0 }
 0x20f   :  { %v487_v20 = vmax.f32 %v457_v18, 0.0  ;;  %v763_v21 = vpop.f32.mrb[30].mxu1 }
 0x210   :  { %v472_v22 = vadd.f32 %v763_v21, %v606_v36  ;;  %v466_v23 = vpop.f32.mrb[31].mxu1 }
 0x211   :  { %v858_v24 = vpack.c.bf16 %v488_v19, %v487_v20  ;;  %v467_v25 = vadd.f32 %v606_v36, %v466_v23 }
 0x212   :  { %v490_v26 = vmax.f32 %v472_v22, 0.0 }
 0x213   :  { %850 = vmatpush3.bf16.xpose.msra.mxu0 %v849_v3  ;;  %v489_v27 = vmax.f32 %v467_v25, 0.0 }
 0x214   :  { %851 = vmatprep.subr.bf16.mxu0 %v973_v32 }
 0x215   :  { %v861_v28 = vpack.c.bf16 %v490_v26, %v489_v27 }
 0x21b   :  { %853 = vmatpush3.bf16.xpose.msra.mxu0 %v852_v10 }
 0x21c   :  { %854 = vmatprep.subr.bf16.mxu0 %v973_v32 }
 0x223   :  { %856 = vmatpush3.bf16.xpose.msra.mxu0 %v855_v17 }
 0x224   :  { %857 = vmatprep.subr.bf16.mxu0 %v973_v32 }
 0x22b   :  { %859 = vmatpush3.bf16.xpose.msra.mxu0 %v858_v24 }
 0x22c   :  { %860 = vmatprep.subr.bf16.mxu0 %v973_v32 }
 0x233   :  { %862 = vmatpush3.bf16.xpose.msra.mxu0 %v861_v28 }
 0x23a   :  { %797 = vmatmul.mubr.f32.vlgmr.msra.gmra.mrb[0].mxu0 %v491_v29 }
 0x30d   :  { %v568_v36 = vpop.f32.mrb[0].mxu0 }
 0x30e   :  { %v569_v37 = vadd.f32 %v568_v36, %v501_v35  ;;  %v798_v38 = vpop.f32.mrb[1].mxu0 }
 0x310   :  { %572 = vst [vmem:[#allocation9] sm:$0x1] %v569_v37 }
 0x311   :  { %951 = shalt.err (!%p948_p0)
}
 0x312   :  { %s952_s23 = scalar_lea.hbm %s1126_s7, 16 }
 0x313   :  { %p953_p1 = scmp.ne.s32.totalorder %s1126_s7, %s952_s23  ;;  %p956_p2 = scmp.lt.u32.totalorder %s952_s23, %s1126_s7 }
 0x315   :  { %p958_p3 = pnand %p956_p2, %p953_p1 }
 0x317   :  { %961 = shalt.err (!%p958_p3)
}
 0x318   :  { %582 = dma.vmem_to_hbm [thread:$0]  %s580_s19, 16, %s1126_s7, [#allocation5]  }
 0x319   :  { %966 = dma.done.wait [#allocation5], 16  }
 0x31a   :  { %967 = vsyncadd [#allocation5], 4294967280 }
 0x31b   :  { %586 = vsyncpa [#allocation4], 1 }
 0x31c   :  { %587 = vsyncpa [#allocation7], 1 }
 0x31d   :  { %588 = vsyncpa [#allocation5], 1 }

</bundles_post_ra>
